<compile_context>
chip_gen: v7x
topology: tpu7x:2x2x1
jax: 0.10.0
libtpu: 0.0.40
codegen_flags: <defaults>
</compile_context>

<pallas_src>
import functools

import numpy as np
import jax
import jax.numpy as jnp
from jax import lax
from jax.experimental import pallas as pl
from jax.experimental.pallas import tpu as pltpu

FS = 30.0
LOWCUT = 0.6
HIGHCUT = 4.0
ORDER = 2
ZERO_PAD = 100
MIN_HR = 40.0
MAX_HR = 180.0

# bf16 feeds the MXU at its native input dtype on every generation (v5e's
# "no bf16" limitation is VPU/EUP only); accumulation is f32 via
# preferred_element_type and the entire epilogue runs on the f32 accumulator.
OPERATOR_DTYPE = jnp.bfloat16


def _round_up(x, m):
    return ((x + m - 1) // m) * m


@functools.lru_cache(maxsize=None)
def _build_fused_operator(L):
    """Single linear operator mapping the raw time-domain signal to
    [real | imag] of the masked, zero-padded FFT of the band-passed,
    mean-removed signal.  Everything before |.|^2 in the PyTorch reference is
    linear, so it all folds into one (L, 2*Kp) matrix (built in float64)."""
    # --- Butterworth-magnitude bandpass (butter_bandpass_torch) as x @ Wf ---
    freqs = np.fft.rfftfreq(L, d=1.0 / FS)
    eps = 1e-12
    f_safe = freqs + eps
    hp = 1.0 / np.sqrt(1.0 + (LOWCUT / f_safe) ** (2 * ORDER))
    lp = 1.0 / np.sqrt(1.0 + (f_safe / HIGHCUT) ** (2 * ORDER))
    H = hp * lp
    H[0] = 0.0
    I = np.eye(L)
    Wf = np.fft.irfft(np.fft.rfft(I, axis=-1) * H[None, :], n=L, axis=-1)  # (L, L)

    # --- mean removal as x @ M ---
    M = I - np.full((L, L), 1.0 / L)

    # --- zero-padded DFT restricted to 40-180 bpm bins, as x @ [C | S] ---
    pad_len = int(ZERO_PAD / 2 * L)
    N = L + 2 * pad_len
    bpm = np.fft.fftfreq(N, 1.0 / FS) * 60.0
    cutoff = N // 2
    bpm = bpm[:cutoff]
    mask = (bpm >= MIN_HR) & (bpm <= MAX_HR)
    k = np.arange(cutoff)[mask].astype(np.float64)
    freqs_m = bpm[mask].astype(np.float64)
    # Zero-padding only adds a unit-magnitude per-bin phase; |FFT|^2 is
    # unchanged, so the pad offset is dropped from the phase.
    n = np.arange(L, dtype=np.float64)
    phase = -2.0 * np.pi * np.outer(n, k) / N                     # (L, K)
    C = np.cos(phase)
    S = np.sin(phase)

    K = C.shape[1]
    Kp = max(128, _round_up(K, 128))                              # lane-friendly pad

    # Fold bandpass + mean-removal into the DFT matrices (offline).
    WM = Wf @ M
    Wfull = np.zeros((L, 2 * Kp), dtype=np.float64)
    Wfull[:, :K] = WM @ C
    Wfull[:, Kp:Kp + K] = WM @ S

    df = float(freqs_m[1] - freqs_m[0])
    f_first = float(freqs_m[0])
    f_last = float(freqs_m[-1])
    # Masked bins are uniformly spaced by construction (fftfreq + contiguous
    # mask); assert once offline so f1 = f_first + mi*df is valid in-kernel.
    assert np.allclose(np.diff(freqs_m), df)
    return Wfull.astype(np.float32), K, Kp, df, f_first, f_last


def _make_kernel(B, Rh, K, Kp, df, f_first, f_last):
    """Rh = padded rows per half; x rows [0:B] are preds, rows [Rh:Rh+B] are gts."""

    def kernel(x_ref, w_ref, out_ref):
        x = x_ref[...]                     # (2*Rh, L)   stacked [preds ; gts]
        W = w_ref[...]                     # (L, 2*Kp)   fused bandpass+demean+DFT

        # One MXU pass: re/im of the masked, zero-padded spectrum for all rows.
        y = jnp.dot(x, W, preferred_element_type=jnp.float32)     # (2*Rh, 2*Kp)
        re = y[:, :Kp]
        im = y[:, Kp:]
        ps = re * re + im * im                                    # (2*Rh, Kp)

        # First-argmax over the lane axis (padded bins have ps == 0, so they
        # can never win for a real signal; all-zero rows fall back to bin 0).
        idx = lax.broadcasted_iota(jnp.int32, ps.shape, 1)
        max_val = jnp.max(ps, axis=-1, keepdims=True)             # == ps[mi]
        mi = jnp.min(jnp.where(ps == max_val, idx, Kp),
                     axis=-1, keepdims=True)                      # (2*Rh, 1)

        # Neighbour picks via iota == mi±1 one-hots (no pltpu.roll: shift must
        # be non-negative, and this is direction-unambiguous and just as cheap).
        def pick(hot):
            return jnp.sum(jnp.where(hot, ps, 0.0), axis=-1, keepdims=True)

        x1 = max_val                                  # ps[mi]
        x0 = pick(idx == mi - 1)                      # ps[mi - 1] (0 if mi == 0)
        x2 = pick(idx == mi + 1)                      # ps[mi + 1]
        f1 = f_first + mi.astype(jnp.float32) * df    # freqs[mi]

        d1 = x1 - x0
        d2 = x1 - x2
        dmin = jnp.minimum(d1, d2)
        dmax = jnp.maximum(d1, d2)
        # Guard the 0/0 case (flat spectrum around the peak): offset -> 0.
        safe = jnp.where(dmax > 0.0, dmax, 1.0)
        offset = (1.0 - dmin / safe) * df
        offset = jnp.where(d2 > d1, -offset, offset)
        offset = jnp.where(dmax > 0.0, offset, 0.0)

        interior = (mi > 0) & (mi < K - 1)
        bpm = jnp.where(interior, f1 + offset,
                        jnp.where(mi == 0, f_first, f_last))      # (2*Rh, 1)

        # L1 loss between the two halves (tile-aligned sublane slices).
        bpm_p = bpm[:Rh, :]                                       # (Rh, 1)
        bpm_g = bpm[Rh:, :]                                       # (Rh, 1)
        row = lax.broadcasted_iota(jnp.int32, bpm_p.shape, 0)
        diff = jnp.abs(bpm_p - bpm_g)
        loss = jnp.sum(jnp.where(row < B, diff, 0.0)) * (1.0 / B)  # nn.L1Loss()
        out_ref[0, 0] = loss

    return kernel


@functools.lru_cache(maxsize=None)
def _get_mae_fn(B, L):
    """Build the operator ONCE per (B, L), keep its device copy persistent,
    and return a jitted callable closing over the compiled pallas_call."""
    Wfull_np, K, Kp, df, f_first, f_last = _build_fused_operator(L)
    Wfull = jnp.asarray(Wfull_np, dtype=OPERATOR_DTYPE)    # persistent device copy
    Rh = max(8, _round_up(B, 8))

    itemsize = np.dtype(OPERATOR_DTYPE).itemsize
    op_bytes = L * 2 * Kp * itemsize
    x_bytes = 2 * Rh * L * itemsize
    inter_bytes = 4 * (2 * Rh) * (2 * Kp) * 4               # y, ps, masks, iota
    vmem_limit = int(min(64 * 2**20,                         # valid on v7x too
                         max(32 * 2**20,
                             2 * (op_bytes + x_bytes) + inter_bytes + 4 * 2**20)))

    vmem = pl.BlockSpec(memory_space=pltpu.MemorySpace.VMEM)
    call = pl.pallas_call(
        _make_kernel(B, Rh, K, Kp, df, f_first, f_last),
        out_shape=jax.ShapeDtypeStruct((1, 1), jnp.float32),
        in_specs=[vmem, vmem],
        out_specs=pl.BlockSpec(memory_space=pltpu.MemorySpace.SMEM),
        compiler_params=pltpu.CompilerParams(vmem_limit_bytes=vmem_limit),
    )
    # TODO(synk): for large B, add grid=(cdiv(B, TB),) with W mapped to a
    # constant block (lambda i: (0, 0) -> DMA'd once, VMEM-resident), per-tile
    # partial losses as the output (B axis "parallel"), summed outside.

    @jax.jit
    def fn(preds, gts, W):
        # Stack preds / gts into one LHS; each half padded to a multiple of 8
        # rows so the hot path is one matmul + one epilogue pass and the final
        # per-half slices stay sublane-tile aligned.
        def pad_rows(a):
            a = a.astype(OPERATOR_DTYPE)
            if Rh > B:
                a = jnp.concatenate(
                    [a, jnp.zeros((Rh - B, L), OPERATOR_DTYPE)], axis=0)
            return a

        x = jnp.concatenate([pad_rows(preds), pad_rows(gts)], axis=0)  # (2*Rh, L)
        return call(x, W)[0, 0]

    return lambda preds, gts: fn(preds, gts, Wfull)


def mean_absolute_error(preds, gts):
    """preds, gts: (B, L) float32 rPPG-like signals -> scalar MAE of heart rates (bpm)."""
    B, L = preds.shape
    return _get_mae_fn(int(B), int(L))(preds, gts)


if __name__ == "__main__":
    B, L = 2, 128
    key = jax.random.PRNGKey(0)
    k1, k2 = jax.random.split(key)
    t = jnp.arange(L, dtype=jnp.float32) / FS
    hr_true = jnp.array([70.0, 95.0], dtype=jnp.float32)          # bpm
    preds = (jnp.sin(2.0 * jnp.pi * (hr_true[:, None] / 60.0) * t[None, :])
             + 0.1 * jax.random.normal(k1, (B, L), dtype=jnp.float32))
    gts = (jnp.sin(2.0 * jnp.pi * (hr_true[:, None] / 60.0 + 0.05) * t[None, :])
           + 0.1 * jax.random.normal(k2, (B, L), dtype=jnp.float32))

    loss = mean_absolute_error(preds, gts)
    jax.block_until_ready(loss)
    print("KERNEL_OK")
</pallas_src>

<mosaic_0001>
module attributes {stable_mosaic.version = 11 : i64} {
  func.func @kernel(%arg0: memref<16x128xbf16, #tpu.memory_space<vmem>>, %arg1: memref<128x2048xbf16, #tpu.memory_space<vmem>>, %arg2: memref<1x1xf32, #tpu.memory_space<smem>>) attributes {dimension_semantics = [], scalar_prefetch = 0 : i64, scratch_operands = 0 : i64, tpu.core_type = #tpu.core_type<tc>} {
    %c0 = arith.constant 0 : index
    %c0_0 = arith.constant 0 : index
    %0 = vector.load %arg0[%c0, %c0_0] : memref<16x128xbf16, #tpu.memory_space<vmem>>, vector<16x128xbf16>
    %c0_1 = arith.constant 0 : index
    %c0_2 = arith.constant 0 : index
    %1 = vector.load %arg1[%c0_1, %c0_2] : memref<128x2048xbf16, #tpu.memory_space<vmem>>, vector<128x2048xbf16>
    %cst = arith.constant dense<0.000000e+00> : vector<16x2048xf32>
    %2 = tpu.matmul %0, %1, %cst {dimension_numbers = #tpu.dot_dimension_numbers<[1], [0], [0], [1], [0, 0, 1, 1], [], []>} : vector<16x128xbf16>, vector<128x2048xbf16>, vector<16x2048xf32> -> vector<16x2048xf32>
    %3 = vector.extract_strided_slice %2 {offsets = [0, 0], sizes = [16, 1024], strides = [1, 1]} : vector<16x2048xf32> to vector<16x1024xf32>
    %4 = vector.extract_strided_slice %2 {offsets = [0, 1024], sizes = [16, 1024], strides = [1, 1]} : vector<16x2048xf32> to vector<16x1024xf32>
    %5 = arith.mulf %3, %3 : vector<16x1024xf32>
    %6 = arith.mulf %4, %4 : vector<16x1024xf32>
    %7 = arith.addf %5, %6 : vector<16x1024xf32>
    %8 = tpu.iota {dimensions = array<i32: 1>} : vector<16x1024xi32>
    %cst_3 = arith.constant dense<0xFF800000> : vector<16xf32>
    %9 = vector.multi_reduction <maximumf>, %7, %cst_3 [1] : vector<16x1024xf32> to vector<16xf32>
    %10 = vector.shape_cast %9 : vector<16xf32> to vector<16x1xf32>
    %11 = vector.broadcast %10 : vector<16x1xf32> to vector<16x1024xf32>
    %12 = arith.cmpf oeq, %7, %11 : vector<16x1024xf32>
    %c1024_i32 = arith.constant 1024 : i32
    %13 = vector.broadcast %c1024_i32 : i32 to vector<16x1024xi32>
    %14 = arith.select %12, %8, %13 : vector<16x1024xi1>, vector<16x1024xi32>
    %cst_4 = arith.constant dense<2147483647> : vector<16xi32>
    %15 = vector.multi_reduction <minsi>, %14, %cst_4 [1] : vector<16x1024xi32> to vector<16xi32>
    %16 = vector.shape_cast %15 : vector<16xi32> to vector<16x1xi32>
    %c1_i32 = arith.constant 1 : i32
    %17 = vector.broadcast %c1_i32 : i32 to vector<16x1xi32>
    %18 = arith.subi %16, %17 : vector<16x1xi32>
    %19 = vector.broadcast %18 : vector<16x1xi32> to vector<16x1024xi32>
    %20 = arith.cmpi eq, %8, %19 : vector<16x1024xi32>
    %cst_5 = arith.constant 0.000000e+00 : f32
    %21 = vector.broadcast %cst_5 : f32 to vector<16x1024xf32>
    %22 = arith.select %20, %7, %21 : vector<16x1024xi1>, vector<16x1024xf32>
    %cst_6 = arith.constant dense<0.000000e+00> : vector<16xf32>
    %23 = vector.multi_reduction <add>, %22, %cst_6 [1] : vector<16x1024xf32> to vector<16xf32>
    %24 = vector.shape_cast %23 : vector<16xf32> to vector<16x1xf32>
    %c1_i32_7 = arith.constant 1 : i32
    %25 = vector.broadcast %c1_i32_7 : i32 to vector<16x1xi32>
    %26 = arith.addi %16, %25 : vector<16x1xi32>
    %27 = vector.broadcast %26 : vector<16x1xi32> to vector<16x1024xi32>
    %28 = arith.cmpi eq, %8, %27 : vector<16x1024xi32>
    %cst_8 = arith.constant 0.000000e+00 : f32
    %29 = vector.broadcast %cst_8 : f32 to vector<16x1024xf32>
    %30 = arith.select %28, %7, %29 : vector<16x1024xi1>, vector<16x1024xf32>
    %cst_9 = arith.constant dense<0.000000e+00> : vector<16xf32>
    %31 = vector.multi_reduction <add>, %30, %cst_9 [1] : vector<16x1024xf32> to vector<16xf32>
    %32 = vector.shape_cast %31 : vector<16xf32> to vector<16x1xf32>
    %33 = arith.sitofp %16 : vector<16x1xi32> to vector<16x1xf32>
    %cst_10 = arith.constant 0.13923268 : f32
    %34 = vector.broadcast %cst_10 : f32 to vector<16x1xf32>
    %35 = arith.mulf %33, %34 : vector<16x1xf32>
    %cst_11 = arith.constant 40.0990105 : f32
    %36 = vector.broadcast %cst_11 : f32 to vector<16x1xf32>
    %37 = arith.addf %36, %35 : vector<16x1xf32>
    %38 = arith.subf %10, %24 : vector<16x1xf32>
    %39 = arith.subf %10, %32 : vector<16x1xf32>
    %40 = arith.minimumf %38, %39 : vector<16x1xf32>
    %41 = arith.maximumf %38, %39 : vector<16x1xf32>
    %cst_12 = arith.constant 0.000000e+00 : f32
    %42 = vector.broadcast %cst_12 : f32 to vector<16x1xf32>
    %43 = arith.cmpf ogt, %41, %42 : vector<16x1xf32>
    %cst_13 = arith.constant 1.000000e+00 : f32
    %44 = vector.broadcast %cst_13 : f32 to vector<16x1xf32>
    %45 = arith.select %43, %41, %44 : vector<16x1xi1>, vector<16x1xf32>
    %46 = arith.divf %40, %45 : vector<16x1xf32>
    %cst_14 = arith.constant 1.000000e+00 : f32
    %47 = vector.broadcast %cst_14 : f32 to vector<16x1xf32>
    %48 = arith.subf %47, %46 : vector<16x1xf32>
    %cst_15 = arith.constant 0.13923268 : f32
    %49 = vector.broadcast %cst_15 : f32 to vector<16x1xf32>
    %50 = arith.mulf %48, %49 : vector<16x1xf32>
    %51 = arith.cmpf ogt, %39, %38 : vector<16x1xf32>
    %cst_16 = arith.constant 0.000000e+00 : f32
    %52 = vector.broadcast %cst_16 : f32 to vector<16x1xf32>
    %53 = arith.subf %52, %50 : vector<16x1xf32>
    %54 = arith.select %51, %53, %50 : vector<16x1xi1>, vector<16x1xf32>
    %cst_17 = arith.constant 0.000000e+00 : f32
    %55 = vector.broadcast %cst_17 : f32 to vector<16x1xf32>
    %56 = arith.cmpf ogt, %41, %55 : vector<16x1xf32>
    %cst_18 = arith.constant 0.000000e+00 : f32
    %57 = vector.broadcast %cst_18 : f32 to vector<16x1xf32>
    %58 = arith.select %56, %54, %57 : vector<16x1xi1>, vector<16x1xf32>
    %c0_i32 = arith.constant 0 : i32
    %59 = vector.broadcast %c0_i32 : i32 to vector<16x1xi32>
    %60 = arith.cmpi sgt, %16, %59 : vector<16x1xi32>
    %c1004_i32 = arith.constant 1004 : i32
    %61 = vector.broadcast %c1004_i32 : i32 to vector<16x1xi32>
    %62 = arith.cmpi slt, %16, %61 : vector<16x1xi32>
    %63 = arith.andi %60, %62 : vector<16x1xi1>
    %64 = arith.addf %37, %58 : vector<16x1xf32>
    %c0_i32_19 = arith.constant 0 : i32
    %65 = vector.broadcast %c0_i32_19 : i32 to vector<16x1xi32>
    %66 = arith.cmpi eq, %16, %65 : vector<16x1xi32>
    %cst_20 = arith.constant 40.0990105 : f32
    %cst_21 = arith.constant 179.888611 : f32
    %67 = vector.broadcast %cst_20 : f32 to vector<16x1xf32>
    %68 = vector.broadcast %cst_21 : f32 to vector<16x1xf32>
    %69 = arith.select %66, %67, %68 : vector<16x1xi1>, vector<16x1xf32>
    %70 = arith.select %63, %64, %69 : vector<16x1xi1>, vector<16x1xf32>
    %71 = vector.extract_strided_slice %70 {offsets = [0, 0], sizes = [8, 1], strides = [1, 1]} : vector<16x1xf32> to vector<8x1xf32>
    %72 = vector.extract_strided_slice %70 {offsets = [8, 0], sizes = [8, 1], strides = [1, 1]} : vector<16x1xf32> to vector<8x1xf32>
    %73 = tpu.iota {dimensions = array<i32: 0>} : vector<8x1xi32>
    %74 = arith.subf %71, %72 : vector<8x1xf32>
    %75 = math.absf %74 : vector<8x1xf32>
    %c2_i32 = arith.constant 2 : i32
    %76 = vector.broadcast %c2_i32 : i32 to vector<8x1xi32>
    %77 = arith.cmpi slt, %73, %76 : vector<8x1xi32>
    %cst_22 = arith.constant 0.000000e+00 : f32
    %78 = vector.broadcast %cst_22 : f32 to vector<8x1xf32>
    %79 = arith.select %77, %75, %78 : vector<8x1xi1>, vector<8x1xf32>
    %80 = vector.shape_cast %79 : vector<8x1xf32> to vector<1x8x1xf32>
    %cst_23 = arith.constant dense<0.000000e+00> : vector<1xf32>
    %81 = vector.multi_reduction <add>, %80, %cst_23 [1, 2] : vector<1x8x1xf32> to vector<1xf32>
    %82 = vector.shape_cast %81 : vector<1xf32> to vector<1x1x1xf32>
    %83 = vector.extract %82[0, 0, 0] : f32 from vector<1x1x1xf32>
    %cst_24 = arith.constant 5.000000e-01 : f32
    %84 = arith.mulf %83, %cst_24 : f32
    %c0_25 = arith.constant 0 : index
    %c0_26 = arith.constant 0 : index
    %85 = memref.load %arg2[%c0_25, %c0_26] : memref<1x1xf32, #tpu.memory_space<smem>>
    memref.store %84, %arg2[%c0_25, %c0_26] : memref<1x1xf32, #tpu.memory_space<smem>>
    return
  }
}

</mosaic_0001>

<bundles_post_ra>
// kernel: fn.1
= control target key start
LH: loop header
LB: loop body
LE: loop exit
PB: predicated region body
PF: predicated region fallthrough
CT: control target
= control target key end

     0   :  { %7 = vsyncpa [#allocation3], 0  ;;  %s1991_s0 = inlined_call_operand.vmem [shape: bf16[16,128], index: 0, kind: input, shape index: {}]   ;;  %s1992_s1 = inlined_call_operand.hbm [shape: bf16[128,2048], index: 1, kind: input, shape index: {}]   ;;  %s1993_s2 = inlined_call_operand.hbm [shape: f32[1,1], index: 2, kind: output, shape index: {}]  }
   0x1   :  { %8 = vsyncpa [#allocation4], 0  ;;  %s1676_s9 = smov [#allocation2]   ;;  %s1640_s13 = scalar_lea.hbm %s1992_s1, 16384 }
   0x2   :  { %s16_s10 = sshll.u32 %s1676_s9, 4  ;;  %p1641_p0 = scmp.ne.s32.totalorder %s1992_s1, %s1640_s13  ;;  %s17_s10 = int_to_ptr.vmem [resolvable:$true] %s16_s10 }
   0x3   :  { %p1644_p1 = scmp.lt.u32.totalorder %s1640_s13, %s1992_s1 }
   0x5   :  { %p1646_p2 = pnand %p1644_p1, %p1641_p0 }
   0x7   :  { %1649 = shalt.err (!%p1646_p2)
}
   0x8   :  { %s1650_s18 = scalar_lea.vmem %s17_s10, 16384  ;;  %p1655_p4 = scmp.lt.s32.totalorder %s17_s10, %s17_s10 }
   0x9   :  { %p1651_p3 = scmp.ne.s32.totalorder %s17_s10, %s1650_s18  ;;  %p1656_p5 = scmp.lt.s32.totalorder %s1650_s18, %s1650_s18 }
   0xb   :  { %p1657_p6 = por %p1656_p5, %p1655_p4 }
   0xd   :  { %p1658_p7 = pnand %p1657_p6, %p1651_p3 }
   0xf   :  { %1661 = shalt.err (!%p1658_p7)
}
  0x10   :  { %s1677_s19 = smov 1024   ;;  %s1678_s20 = smov 64  }
  0x11   :  { %22 = dma.hbm_to_vmem [thread:$0]  %s1992_s1, 16384, %s17_s10, [#allocation3], %s1677_s19, %s1677_s19, %s1678_s20  }
  0x12   :  { %1672 = dma.done.wait [#allocation3], 16384  }
  0x13   :  { %1673 = vsyncadd [#allocation3], 4294950912  ;;  %v1679_v0 = vmov 0   ;;  %v29_v1 = vld [vmem:[#allocation2] sm:$0xff]  ;;  %v30_v3 = vld [vmem:[#allocation2 + $0x8] sm:$0xff]  ;;  %s1662_s27 = scalar_lea.hbm %s1993_s2, 16 }
  0x14   :  { %835 = vmatprep.mubr.bf16.mxu0 %v1679_v0  ;;  %878 = vmatprep.mubr.bf16.mxu1 %v1679_v0  ;;  %v37_v2 = vld [vmem:[#allocation2 + $0x40] sm:$0xff]  ;;  %v38_v5 = vld [vmem:[#allocation2 + $0x48] sm:$0xff]  ;;  %v31_v63 = vld [vmem:[#allocation2 + $0x10] sm:$0xff]  ;;  %p1663_p8 = scmp.ne.s32.totalorder %s1993_s2, %s1662_s27  ;;  %p1666_p9 = scmp.lt.u32.totalorder %s1662_s27, %s1993_s2 }
  0x15   :  { %v1498_v4 = vcombine.high %v29_v1, %v37_v2  ;;  %v1497_v6 = vcombine.low %v29_v1, %v37_v2  ;;  %v45_v7 = vld [vmem:[#allocation2 + $0x80] sm:$0xff]  ;;  %v1500_v9 = vcombine.high %v30_v3, %v38_v5  ;;  %v1499_v10 = vcombine.low %v30_v3, %v38_v5  ;;  %v46_v12 = vld [vmem:[#allocation2 + $0x88] sm:$0xff]  ;;  %v39_v1 = vld [vmem:[#allocation2 + $0x50] sm:$0xff] }
  0x16   :  { %v53_v8 = vld [vmem:[#allocation2 + $0xc0] sm:$0xff]  ;;  %v54_v13 = vld [vmem:[#allocation2 + $0xc8] sm:$0xff]  ;;  %v32_v2 = vld [vmem:[#allocation2 + $0x18] sm:$0xff]  ;;  %p1668_p10 = pnand %p1666_p9, %p1663_p8 }
  0x17   :  { %v1514_v11 = vcombine.high %v45_v7, %v53_v8  ;;  %v61_v14 = vld [vmem:[#allocation2 + $0x100] sm:$0xff]  ;;  %803 = vmatprep.subr.bf16.mxu0 %v1498_v4  ;;  %v1516_v15 = vcombine.high %v46_v12, %v54_v13  ;;  %v62_v17 = vld [vmem:[#allocation2 + $0x108] sm:$0xff]  ;;  %846 = vmatprep.subr.bf16.mxu1 %v1500_v9  ;;  %v1513_v19 = vcombine.low %v45_v7, %v53_v8  ;;  %v40_v3 = vld [vmem:[#allocation2 + $0x58] sm:$0xff] }
  0x18   :  { %v69_v16 = vld [vmem:[#allocation2 + $0x140] sm:$0xff]  ;;  %v70_v18 = vld [vmem:[#allocation2 + $0x148] sm:$0xff]  ;;  %804 = vmatpush1.bf16.msra.mxu0 %v1497_v6  ;;  %847 = vmatpush1.bf16.msra.mxu1 %v1499_v10  ;;  %v1515_v20 = vcombine.low %v46_v12, %v54_v13  ;;  %v1502_v6 = vcombine.high %v31_v63, %v39_v1  ;;  %v1504_v7 = vcombine.high %v32_v2, %v40_v3  ;;  %v47_v8 = vld [vmem:[#allocation2 + $0x90] sm:$0xff] }
  0x19   :  { %805 = vmatprep.subr.bf16.mxu0 %v1514_v11  ;;  %v1530_v21 = vcombine.high %v61_v14, %v69_v16  ;;  %848 = vmatprep.subr.bf16.mxu1 %v1516_v15  ;;  %v1532_v22 = vcombine.high %v62_v17, %v70_v18  ;;  %v77_v23 = vld [vmem:[#allocation2 + $0x180] sm:$0xff]  ;;  %v78_v25 = vld [vmem:[#allocation2 + $0x188] sm:$0xff]  ;;  %v1529_v27 = vcombine.low %v61_v14, %v69_v16  ;;  %v55_v9 = vld [vmem:[#allocation2 + $0xd0] sm:$0xff] }
  0x1a   :  { %v85_v24 = vld [vmem:[#allocation2 + $0x1c0] sm:$0xff]  ;;  %v86_v26 = vld [vmem:[#allocation2 + $0x1c8] sm:$0xff]  ;;  %v1531_v28 = vcombine.low %v62_v17, %v70_v18  ;;  %v48_v11 = vld [vmem:[#allocation2 + $0x98] sm:$0xff]  ;;  %v1501_v13 = vcombine.low %v31_v63, %v39_v1  ;;  %v1503_v14 = vcombine.low %v32_v2, %v40_v3  ;;  %v1518_v15 = vcombine.high %v47_v8, %v55_v9 }
  0x1b   :  { %v1546_v29 = vcombine.high %v77_v23, %v85_v24  ;;  %v1548_v30 = vcombine.high %v78_v25, %v86_v26  ;;  %v93_v31 = vld [vmem:[#allocation2 + $0x200] sm:$0xff]  ;;  %v94_v33 = vld [vmem:[#allocation2 + $0x208] sm:$0xff]  ;;  %v1545_v35 = vcombine.low %v77_v23, %v85_v24  ;;  %v1547_v36 = vcombine.low %v78_v25, %v86_v26  ;;  %v56_v12 = vld [vmem:[#allocation2 + $0xd8] sm:$0xff] }
  0x1c   :  { %806 = vmatpush1.bf16.msra.mxu0 %v1513_v19  ;;  %849 = vmatpush1.bf16.msra.mxu1 %v1515_v20  ;;  %v101_v32 = vld [vmem:[#allocation2 + $0x240] sm:$0xff]  ;;  %v102_v34 = vld [vmem:[#allocation2 + $0x248] sm:$0xff]  ;;  %v1520_v16 = vcombine.high %v48_v11, %v56_v12  ;;  %v63_v17 = vld [vmem:[#allocation2 + $0x110] sm:$0xff] }
  0x1d   :  { %807 = vmatprep.subr.bf16.mxu0 %v1530_v21  ;;  %850 = vmatprep.subr.bf16.mxu1 %v1532_v22  ;;  %v1562_v37 = vcombine.high %v93_v31, %v101_v32  ;;  %v1564_v38 = vcombine.high %v94_v33, %v102_v34  ;;  %v109_v39 = vld [vmem:[#allocation2 + $0x280] sm:$0xff]  ;;  %v110_v41 = vld [vmem:[#allocation2 + $0x288] sm:$0xff]  ;;  %v1561_v43 = vcombine.low %v93_v31, %v101_v32  ;;  %v71_v18 = vld [vmem:[#allocation2 + $0x150] sm:$0xff] }
  0x1e   :  { %v117_v40 = vld [vmem:[#allocation2 + $0x2c0] sm:$0xff]  ;;  %v118_v42 = vld [vmem:[#allocation2 + $0x2c8] sm:$0xff]  ;;  %v1563_v44 = vcombine.low %v94_v33, %v102_v34  ;;  %v64_v19 = vld [vmem:[#allocation2 + $0x118] sm:$0xff]  ;;  %v1517_v21 = vcombine.low %v47_v8, %v55_v9  ;;  %v1519_v22 = vcombine.low %v48_v11, %v56_v12  ;;  %v1534_v23 = vcombine.high %v63_v17, %v71_v18 }
  0x1f   :  { %v1578_v45 = vcombine.high %v109_v39, %v117_v40  ;;  %v1580_v46 = vcombine.high %v110_v41, %v118_v42  ;;  %v125_v47 = vld [vmem:[#allocation2 + $0x300] sm:$0xff]  ;;  %v126_v49 = vld [vmem:[#allocation2 + $0x308] sm:$0xff]  ;;  %v1577_v51 = vcombine.low %v109_v39, %v117_v40  ;;  %v1579_v52 = vcombine.low %v110_v41, %v118_v42  ;;  %v72_v20 = vld [vmem:[#allocation2 + $0x158] sm:$0xff] }
  0x20   :  { %808 = vmatpush1.bf16.msra.mxu0 %v1529_v27  ;;  %851 = vmatpush1.bf16.msra.mxu1 %v1531_v28  ;;  %v133_v48 = vld [vmem:[#allocation2 + $0x340] sm:$0xff]  ;;  %v134_v50 = vld [vmem:[#allocation2 + $0x348] sm:$0xff]  ;;  %v1536_v24 = vcombine.high %v64_v19, %v72_v20  ;;  %v79_v25 = vld [vmem:[#allocation2 + $0x190] sm:$0xff] }
  0x21   :  { %809 = vmatprep.subr.bf16.mxu0 %v1546_v29  ;;  %852 = vmatprep.subr.bf16.mxu1 %v1548_v30  ;;  %v1594_v53 = vcombine.high %v125_v47, %v133_v48  ;;  %v1596_v54 = vcombine.high %v126_v49, %v134_v50  ;;  %v141_v55 = vld [vmem:[#allocation2 + $0x380] sm:$0xff]  ;;  %v142_v57 = vld [vmem:[#allocation2 + $0x388] sm:$0xff]  ;;  %v1593_v59 = vcombine.low %v125_v47, %v133_v48  ;;  %v87_v26 = vld [vmem:[#allocation2 + $0x1d0] sm:$0xff] }
  0x22   :  { %v149_v56 = vld [vmem:[#allocation2 + $0x3c0] sm:$0xff]  ;;  %v150_v58 = vld [vmem:[#allocation2 + $0x3c8] sm:$0xff]  ;;  %v1595_v60 = vcombine.low %v126_v49, %v134_v50  ;;  %v80_v27 = vld [vmem:[#allocation2 + $0x198] sm:$0xff]  ;;  %v1533_v29 = vcombine.low %v63_v17, %v71_v18  ;;  %v1535_v30 = vcombine.low %v64_v19, %v72_v20  ;;  %v1550_v31 = vcombine.high %v79_v25, %v87_v26 }
  0x23   :  { %v1610_v61 = vcombine.high %v141_v55, %v149_v56  ;;  %v1612_v62 = vcombine.high %v142_v57, %v150_v58  ;;  %v1609_v4 = vcombine.low %v141_v55, %v149_v56  ;;  %v1611_v5 = vcombine.low %v142_v57, %v150_v58  ;;  %v1714_v10 = vld [vmem:[%s1991_s0] sm:$0xff]   ;;  %v88_v28 = vld [vmem:[#allocation2 + $0x1d8] sm:$0xff]  ;;  %v95_v33 = vld [vmem:[#allocation2 + $0x210] sm:$0xff] }
  0x24   :  { %810 = vmatpush1.bf16.msra.mxu0 %v1545_v35  ;;  %853 = vmatpush1.bf16.msra.mxu1 %v1547_v36  ;;  %v1552_v32 = vcombine.high %v80_v27, %v88_v28  ;;  %v103_v34 = vld [vmem:[#allocation2 + $0x250] sm:$0xff]  ;;  %v96_v35 = vld [vmem:[#allocation2 + $0x218] sm:$0xff]  ;;  %v33_v2 = vld [vmem:[#allocation2 + $0x20] sm:$0xff] }
  0x25   :  { %811 = vmatprep.subr.bf16.mxu0 %v1562_v37  ;;  %854 = vmatprep.subr.bf16.mxu1 %v1564_v38  ;;  %v104_v36 = vld [vmem:[#allocation2 + $0x258] sm:$0xff]  ;;  %v1549_v37 = vcombine.low %v79_v25, %v87_v26  ;;  %v1551_v38 = vcombine.low %v80_v27, %v88_v28  ;;  %v1566_v39 = vcombine.high %v95_v33, %v103_v34  ;;  %v111_v41 = vld [vmem:[#allocation2 + $0x290] sm:$0xff]  ;;  %v41_v3 = vld [vmem:[#allocation2 + $0x60] sm:$0xff] }
  0x26   :  { %v1568_v40 = vcombine.high %v96_v35, %v104_v36  ;;  %v119_v42 = vld [vmem:[#allocation2 + $0x2d0] sm:$0xff]  ;;  %v1506_v8 = vcombine.high %v33_v2, %v41_v3  ;;  %v49_v11 = vld [vmem:[#allocation2 + $0xa0] sm:$0xff] }
  0x27   :  { %v1582_v47 = vcombine.high %v111_v41, %v119_v42  ;;  %v127_v49 = vld [vmem:[#allocation2 + $0x310] sm:$0xff]  ;;  %v57_v12 = vld [vmem:[#allocation2 + $0xe0] sm:$0xff] }
  0x28   :  { %812 = vmatpush1.bf16.msra.mxu0 %v1561_v43  ;;  %855 = vmatpush1.bf16.msra.mxu1 %v1563_v44  ;;  %v112_v43 = vld [vmem:[#allocation2 + $0x298] sm:$0xff]  ;;  %v135_v50 = vld [vmem:[#allocation2 + $0x350] sm:$0xff]  ;;  %v1522_v17 = vcombine.high %v49_v11, %v57_v12  ;;  %v65_v19 = vld [vmem:[#allocation2 + $0x120] sm:$0xff] }
  0x29   :  { %813 = vmatprep.subr.bf16.mxu0 %v1578_v45  ;;  %856 = vmatprep.subr.bf16.mxu1 %v1580_v46  ;;  %v120_v44 = vld [vmem:[#allocation2 + $0x2d8] sm:$0xff]  ;;  %v1565_v45 = vcombine.low %v95_v33, %v103_v34  ;;  %v1567_v46 = vcombine.low %v96_v35, %v104_v36  ;;  %v1598_v55 = vcombine.high %v127_v49, %v135_v50  ;;  %v143_v57 = vld [vmem:[#allocation2 + $0x390] sm:$0xff]  ;;  %v73_v20 = vld [vmem:[#allocation2 + $0x160] sm:$0xff] }
  0x2a   :  { %v1584_v48 = vcombine.high %v112_v43, %v120_v44  ;;  %v151_v58 = vld [vmem:[#allocation2 + $0x3d0] sm:$0xff]  ;;  %v1538_v25 = vcombine.high %v65_v19, %v73_v20  ;;  %v81_v27 = vld [vmem:[#allocation2 + $0x1a0] sm:$0xff] }
  0x2b   :  { %v1614_v63 = vcombine.high %v143_v57, %v151_v58  ;;  %v89_v28 = vld [vmem:[#allocation2 + $0x1e0] sm:$0xff] }
  0x2c   :  { %814 = vmatpush1.bf16.msra.mxu0 %v1577_v51  ;;  %857 = vmatpush1.bf16.msra.mxu1 %v1579_v52  ;;  %v128_v51 = vld [vmem:[#allocation2 + $0x318] sm:$0xff]  ;;  %v1554_v33 = vcombine.high %v81_v27, %v89_v28  ;;  %v97_v35 = vld [vmem:[#allocation2 + $0x220] sm:$0xff] }
  0x2d   :  { %815 = vmatprep.subr.bf16.mxu0 %v1594_v53  ;;  %858 = vmatprep.subr.bf16.mxu1 %v1596_v54  ;;  %v136_v52 = vld [vmem:[#allocation2 + $0x358] sm:$0xff]  ;;  %v1581_v53 = vcombine.low %v111_v41, %v119_v42  ;;  %v1583_v54 = vcombine.low %v112_v43, %v120_v44  ;;  %v105_v36 = vld [vmem:[#allocation2 + $0x260] sm:$0xff] }
  0x2e   :  { %v1600_v56 = vcombine.high %v128_v51, %v136_v52  ;;  %v1570_v41 = vcombine.high %v97_v35, %v105_v36  ;;  %v113_v43 = vld [vmem:[#allocation2 + $0x2a0] sm:$0xff] }
  0x2f   :  { %v121_v44 = vld [vmem:[#allocation2 + $0x2e0] sm:$0xff] }
  0x30   :  { %816 = vmatpush1.bf16.msra.mxu0 %v1593_v59  ;;  %859 = vmatpush1.bf16.msra.mxu1 %v1595_v60  ;;  %v144_v59 = vld [vmem:[#allocation2 + $0x398] sm:$0xff] }
  0x31   :  { %817 = vmatprep.subr.bf16.mxu0 %v1610_v61  ;;  %860 = vmatprep.subr.bf16.mxu1 %v1612_v62  ;;  %v152_v60 = vld [vmem:[#allocation2 + $0x3d8] sm:$0xff]  ;;  %v1597_v61 = vcombine.low %v127_v49, %v135_v50  ;;  %v1599_v62 = vcombine.low %v128_v51, %v136_v52  ;;  %v1586_v49 = vcombine.high %v113_v43, %v121_v44  ;;  %v129_v51 = vld [vmem:[#allocation2 + $0x320] sm:$0xff] }
  0x32   :  { %v1616_v1 = vcombine.high %v144_v59, %v152_v60  ;;  %v137_v52 = vld [vmem:[#allocation2 + $0x360] sm:$0xff] }
  0x34   :  { %818 = vmatpush1.bf16.msra.mxu0 %v1609_v4  ;;  %861 = vmatpush1.bf16.msra.mxu1 %v1611_v5  ;;  %v34_v4 = vld [vmem:[#allocation2 + $0x28] sm:$0xff] }
  0x35   :  { %889 = vmatprep.subr.bf16.mxu0 %v1502_v6  ;;  %932 = vmatprep.subr.bf16.mxu1 %v1504_v7  ;;  %v42_v5 = vld [vmem:[#allocation2 + $0x68] sm:$0xff]  ;;  %v1613_v6 = vcombine.low %v143_v57, %v151_v58  ;;  %v1615_v7 = vcombine.low %v144_v59, %v152_v60  ;;  %v1602_v57 = vcombine.high %v129_v51, %v137_v52  ;;  %v145_v59 = vld [vmem:[#allocation2 + $0x3a0] sm:$0xff] }
  0x36   :  { %v1508_v9 = vcombine.high %v34_v4, %v42_v5  ;;  %v153_v60 = vld [vmem:[#allocation2 + $0x3e0] sm:$0xff] }
  0x37   :  { %836 = vmatmul.mubr.bf16.vlgmr.msra.gmra.mrb[0].mxu0 %v1714_v10  ;;  %879 = vmatmul.mubr.bf16.vlgmr.msra.gmra.mrb[0].mxu1 %v1714_v10 }
  0x38   :  { %890 = vmatpush1.bf16.msra.mxu0 %v1501_v13  ;;  %933 = vmatpush1.bf16.msra.mxu1 %v1503_v14  ;;  %v50_v13 = vld [vmem:[#allocation2 + $0xa8] sm:$0xff] }
  0x39   :  { %891 = vmatprep.subr.bf16.mxu0 %v1518_v15  ;;  %934 = vmatprep.subr.bf16.mxu1 %v1520_v16  ;;  %v58_v14 = vld [vmem:[#allocation2 + $0xe8] sm:$0xff]  ;;  %v1505_v15 = vcombine.low %v33_v2, %v41_v3  ;;  %v1507_v16 = vcombine.low %v34_v4, %v42_v5  ;;  %v1618_v2 = vcombine.high %v145_v59, %v153_v60  ;;  %v35_v4 = vld [vmem:[#allocation2 + $0x30] sm:$0xff] }
  0x3a   :  { %921 = vmatprep.mubr.bf16.mxu0 %v1679_v0  ;;  %964 = vmatprep.mubr.bf16.mxu1 %v1679_v0  ;;  %v1524_v18 = vcombine.high %v50_v13, %v58_v14  ;;  %v43_v5 = vld [vmem:[#allocation2 + $0x70] sm:$0xff] }
  0x3c   :  { %892 = vmatpush1.bf16.msra.mxu0 %v1517_v21  ;;  %935 = vmatpush1.bf16.msra.mxu1 %v1519_v22  ;;  %v66_v21 = vld [vmem:[#allocation2 + $0x128] sm:$0xff] }
  0x3d   :  { %893 = vmatprep.subr.bf16.mxu0 %v1534_v23  ;;  %936 = vmatprep.subr.bf16.mxu1 %v1536_v24  ;;  %v74_v22 = vld [vmem:[#allocation2 + $0x168] sm:$0xff]  ;;  %v1521_v23 = vcombine.low %v49_v11, %v57_v12  ;;  %v1523_v24 = vcombine.low %v50_v13, %v58_v14  ;;  %v1510_v11 = vcombine.high %v35_v4, %v43_v5  ;;  %v51_v13 = vld [vmem:[#allocation2 + $0xb0] sm:$0xff] }
  0x3e   :  { %v1540_v26 = vcombine.high %v66_v21, %v74_v22  ;;  %v59_v14 = vld [vmem:[#allocation2 + $0xf0] sm:$0xff] }
  0x40   :  { %894 = vmatpush1.bf16.msra.mxu0 %v1533_v29  ;;  %937 = vmatpush1.bf16.msra.mxu1 %v1535_v30  ;;  %v82_v29 = vld [vmem:[#allocation2 + $0x1a8] sm:$0xff] }
  0x41   :  { %895 = vmatprep.subr.bf16.mxu0 %v1550_v31  ;;  %938 = vmatprep.subr.bf16.mxu1 %v1552_v32  ;;  %v90_v30 = vld [vmem:[#allocation2 + $0x1e8] sm:$0xff]  ;;  %v1537_v31 = vcombine.low %v65_v19, %v73_v20  ;;  %v1539_v32 = vcombine.low %v66_v21, %v74_v22  ;;  %v1526_v19 = vcombine.high %v51_v13, %v59_v14  ;;  %v67_v21 = vld [vmem:[#allocation2 + $0x130] sm:$0xff] }
  0x42   :  { %v1556_v34 = vcombine.high %v82_v29, %v90_v30  ;;  %v75_v22 = vld [vmem:[#allocation2 + $0x170] sm:$0xff] }
  0x44   :  { %896 = vmatpush1.bf16.msra.mxu0 %v1549_v37  ;;  %939 = vmatpush1.bf16.msra.mxu1 %v1551_v38  ;;  %v98_v37 = vld [vmem:[#allocation2 + $0x228] sm:$0xff] }
  0x45   :  { %897 = vmatprep.subr.bf16.mxu0 %v1566_v39  ;;  %940 = vmatprep.subr.bf16.mxu1 %v1568_v40  ;;  %v106_v38 = vld [vmem:[#allocation2 + $0x268] sm:$0xff]  ;;  %v1553_v39 = vcombine.low %v81_v27, %v89_v28  ;;  %v1555_v40 = vcombine.low %v82_v29, %v90_v30  ;;  %v1542_v27 = vcombine.high %v67_v21, %v75_v22  ;;  %v83_v29 = vld [vmem:[#allocation2 + $0x1b0] sm:$0xff] }
  0x46   :  { %v1572_v42 = vcombine.high %v98_v37, %v106_v38  ;;  %v91_v30 = vld [vmem:[#allocation2 + $0x1f0] sm:$0xff] }
  0x48   :  { %898 = vmatpush1.bf16.msra.mxu0 %v1565_v45  ;;  %941 = vmatpush1.bf16.msra.mxu1 %v1567_v46  ;;  %v114_v45 = vld [vmem:[#allocation2 + $0x2a8] sm:$0xff] }
  0x49   :  { %899 = vmatprep.subr.bf16.mxu0 %v1582_v47  ;;  %942 = vmatprep.subr.bf16.mxu1 %v1584_v48  ;;  %v122_v46 = vld [vmem:[#allocation2 + $0x2e8] sm:$0xff]  ;;  %v1569_v47 = vcombine.low %v97_v35, %v105_v36  ;;  %v1571_v48 = vcombine.low %v98_v37, %v106_v38  ;;  %v1558_v35 = vcombine.high %v83_v29, %v91_v30  ;;  %v99_v37 = vld [vmem:[#allocation2 + $0x230] sm:$0xff] }
  0x4a   :  { %v1588_v50 = vcombine.high %v114_v45, %v122_v46  ;;  %v107_v38 = vld [vmem:[#allocation2 + $0x270] sm:$0xff] }
  0x4c   :  { %900 = vmatpush1.bf16.msra.mxu0 %v1581_v53  ;;  %943 = vmatpush1.bf16.msra.mxu1 %v1583_v54  ;;  %v130_v53 = vld [vmem:[#allocation2 + $0x328] sm:$0xff] }
  0x4d   :  { %901 = vmatprep.subr.bf16.mxu0 %v1598_v55  ;;  %944 = vmatprep.subr.bf16.mxu1 %v1600_v56  ;;  %v138_v54 = vld [vmem:[#allocation2 + $0x368] sm:$0xff]  ;;  %v1585_v55 = vcombine.low %v113_v43, %v121_v44  ;;  %v1587_v56 = vcombine.low %v114_v45, %v122_v46  ;;  %v1574_v43 = vcombine.high %v99_v37, %v107_v38  ;;  %v115_v44 = vld [vmem:[#allocation2 + $0x2b0] sm:$0xff]  ;;  %v116_v46 = vld [vmem:[#allocation2 + $0x2b8] sm:$0xff] }
  0x4e   :  { %v1604_v58 = vcombine.high %v130_v53, %v138_v54  ;;  %v123_v45 = vld [vmem:[#allocation2 + $0x2f0] sm:$0xff] }
  0x50   :  { %902 = vmatpush1.bf16.msra.mxu0 %v1597_v61  ;;  %945 = vmatpush1.bf16.msra.mxu1 %v1599_v62  ;;  %v146_v61 = vld [vmem:[#allocation2 + $0x3a8] sm:$0xff] }
  0x51   :  { %903 = vmatprep.subr.bf16.mxu0 %v1614_v63  ;;  %946 = vmatprep.subr.bf16.mxu1 %v1616_v1  ;;  %v154_v62 = vld [vmem:[#allocation2 + $0x3e8] sm:$0xff]  ;;  %v1601_v63 = vcombine.low %v129_v51, %v137_v52  ;;  %v1603_v1 = vcombine.low %v130_v53, %v138_v54  ;;  %v131_v52 = vld [vmem:[#allocation2 + $0x330] sm:$0xff]  ;;  %v132_v54 = vld [vmem:[#allocation2 + $0x338] sm:$0xff] }
  0x52   :  { %v1620_v3 = vcombine.high %v146_v61, %v154_v62  ;;  %v139_v53 = vld [vmem:[#allocation2 + $0x370] sm:$0xff] }
  0x54   :  { %904 = vmatpush1.bf16.msra.mxu0 %v1613_v6  ;;  %947 = vmatpush1.bf16.msra.mxu1 %v1615_v7  ;;  %v36_v6 = vld [vmem:[#allocation2 + $0x38] sm:$0xff] }
  0x55   :  { %975 = vmatprep.subr.bf16.mxu0 %v1506_v8  ;;  %1018 = vmatprep.subr.bf16.mxu1 %v1508_v9  ;;  %v44_v7 = vld [vmem:[#allocation2 + $0x78] sm:$0xff]  ;;  %v1617_v8 = vcombine.low %v145_v59, %v153_v60  ;;  %v1619_v9 = vcombine.low %v146_v61, %v154_v62  ;;  %v147_v60 = vld [vmem:[#allocation2 + $0x3b0] sm:$0xff] }
  0x56   :  { %v1512_v12 = vcombine.high %v36_v6, %v44_v7  ;;  %v155_v61 = vld [vmem:[#allocation2 + $0x3f0] sm:$0xff]  ;;  %v148_v62 = vld [vmem:[#allocation2 + $0x3b8] sm:$0xff] }
  0x57   :  { %922 = vmatmul.mubr.bf16.vlgmr.msra.gmra.mrb[4].mxu0 %v1714_v10  ;;  %965 = vmatmul.mubr.bf16.vlgmr.msra.gmra.mrb[4].mxu1 %v1714_v10 }
  0x58   :  { %976 = vmatpush1.bf16.msra.mxu0 %v1505_v15  ;;  %1019 = vmatpush1.bf16.msra.mxu1 %v1507_v16  ;;  %v52_v15 = vld [vmem:[#allocation2 + $0xb8] sm:$0xff] }
  0x59   :  { %977 = vmatprep.subr.bf16.mxu0 %v1522_v17  ;;  %1020 = vmatprep.subr.bf16.mxu1 %v1524_v18  ;;  %v60_v16 = vld [vmem:[#allocation2 + $0xf8] sm:$0xff]  ;;  %v1509_v17 = vcombine.low %v35_v4, %v43_v5  ;;  %v1511_v18 = vcombine.low %v36_v6, %v44_v7  ;;  %v1621_v5 = vcombine.low %v147_v60, %v155_v61 }
  0x5a   :  { %1007 = vmatprep.mubr.bf16.mxu0 %v1679_v0  ;;  %1050 = vmatprep.mubr.bf16.mxu1 %v1679_v0  ;;  %v1528_v20 = vcombine.high %v52_v15, %v60_v16 }
  0x5c   :  { %978 = vmatpush1.bf16.msra.mxu0 %v1521_v23  ;;  %1021 = vmatpush1.bf16.msra.mxu1 %v1523_v24  ;;  %v68_v23 = vld [vmem:[#allocation2 + $0x138] sm:$0xff] }
  0x5d   :  { %979 = vmatprep.subr.bf16.mxu0 %v1538_v25  ;;  %1022 = vmatprep.subr.bf16.mxu1 %v1540_v26  ;;  %v76_v24 = vld [vmem:[#allocation2 + $0x178] sm:$0xff]  ;;  %v1525_v25 = vcombine.low %v51_v13, %v59_v14  ;;  %v1527_v26 = vcombine.low %v52_v15, %v60_v16 }
  0x5e   :  { %v1544_v28 = vcombine.high %v68_v23, %v76_v24 }
  0x60   :  { %980 = vmatpush1.bf16.msra.mxu0 %v1537_v31  ;;  %1023 = vmatpush1.bf16.msra.mxu1 %v1539_v32  ;;  %v84_v31 = vld [vmem:[#allocation2 + $0x1b8] sm:$0xff] }
  0x61   :  { %981 = vmatprep.subr.bf16.mxu0 %v1554_v33  ;;  %1024 = vmatprep.subr.bf16.mxu1 %v1556_v34  ;;  %v92_v32 = vld [vmem:[#allocation2 + $0x1f8] sm:$0xff]  ;;  %v1541_v33 = vcombine.low %v67_v21, %v75_v22  ;;  %v1543_v34 = vcombine.low %v68_v23, %v76_v24 }
  0x62   :  { %v1560_v36 = vcombine.high %v84_v31, %v92_v32 }
  0x64   :  { %982 = vmatpush1.bf16.msra.mxu0 %v1553_v39  ;;  %1025 = vmatpush1.bf16.msra.mxu1 %v1555_v40  ;;  %v100_v39 = vld [vmem:[#allocation2 + $0x238] sm:$0xff] }
  0x65   :  { %983 = vmatprep.subr.bf16.mxu0 %v1570_v41  ;;  %1026 = vmatprep.subr.bf16.mxu1 %v1572_v42  ;;  %v108_v40 = vld [vmem:[#allocation2 + $0x278] sm:$0xff]  ;;  %v1557_v41 = vcombine.low %v83_v29, %v91_v30  ;;  %v1559_v42 = vcombine.low %v84_v31, %v92_v32 }
  0x68   :  { %984 = vmatpush1.bf16.msra.mxu0 %v1569_v47  ;;  %1027 = vmatpush1.bf16.msra.mxu1 %v1571_v48  ;;  %v124_v47 = vld [vmem:[#allocation2 + $0x2f8] sm:$0xff]  ;;  %v1573_v48 = vcombine.low %v99_v37, %v107_v38 }
  0x69   :  { %985 = vmatprep.subr.bf16.mxu0 %v1586_v49  ;;  %1028 = vmatprep.subr.bf16.mxu1 %v1588_v50  ;;  %v1575_v49 = vcombine.low %v100_v39, %v108_v40  ;;  %v1590_v50 = vcombine.high %v115_v44, %v123_v45  ;;  %v1592_v51 = vcombine.high %v116_v46, %v124_v47 }
  0x6c   :  { %986 = vmatpush1.bf16.msra.mxu0 %v1585_v55  ;;  %1029 = vmatpush1.bf16.msra.mxu1 %v1587_v56  ;;  %v140_v55 = vld [vmem:[#allocation2 + $0x378] sm:$0xff]  ;;  %v1589_v56 = vcombine.low %v115_v44, %v123_v45 }
  0x6d   :  { %987 = vmatprep.subr.bf16.mxu0 %v1602_v57  ;;  %1030 = vmatprep.subr.bf16.mxu1 %v1604_v58  ;;  %v1591_v57 = vcombine.low %v116_v46, %v124_v47  ;;  %v1606_v58 = vcombine.high %v131_v52, %v139_v53  ;;  %v1608_v59 = vcombine.high %v132_v54, %v140_v55 }
  0x70   :  { %988 = vmatpush1.bf16.msra.mxu0 %v1601_v63  ;;  %1031 = vmatpush1.bf16.msra.mxu1 %v1603_v1  ;;  %v156_v63 = vld [vmem:[#allocation2 + $0x3f8] sm:$0xff]  ;;  %v1605_v1 = vcombine.low %v131_v52, %v139_v53 }
  0x71   :  { %989 = vmatprep.subr.bf16.mxu0 %v1618_v2  ;;  %1032 = vmatprep.subr.bf16.mxu1 %v1620_v3  ;;  %v1607_v2 = vcombine.low %v132_v54, %v140_v55  ;;  %v1622_v3 = vcombine.high %v147_v60, %v155_v61  ;;  %v1624_v4 = vcombine.high %v148_v62, %v156_v63 }
  0x72   :  { %v1623_v6 = vcombine.low %v148_v62, %v156_v63 }
  0x74   :  { %990 = vmatpush1.bf16.msra.mxu0 %v1617_v8  ;;  %1033 = vmatpush1.bf16.msra.mxu1 %v1619_v9 }
  0x75   :  { %1061 = vmatprep.subr.bf16.mxu0 %v1510_v11  ;;  %1104 = vmatprep.subr.bf16.mxu1 %v1512_v12 }
  0x77   :  { %1008 = vmatmul.mubr.bf16.vlgmr.msra.gmra.mrb[8].mxu0 %v1714_v10  ;;  %1051 = vmatmul.mubr.bf16.vlgmr.msra.gmra.mrb[8].mxu1 %v1714_v10 }
  0x78   :  { %1062 = vmatpush1.bf16.msra.mxu0 %v1509_v17  ;;  %1105 = vmatpush1.bf16.msra.mxu1 %v1511_v18 }
  0x79   :  { %1063 = vmatprep.subr.bf16.mxu0 %v1526_v19  ;;  %1106 = vmatprep.subr.bf16.mxu1 %v1528_v20 }
  0x7a   :  { %1093 = vmatprep.mubr.bf16.mxu0 %v1679_v0  ;;  %1136 = vmatprep.mubr.bf16.mxu1 %v1679_v0  ;;  %v1576_v0 = vcombine.high %v100_v39, %v108_v40 }
  0x7c   :  { %1064 = vmatpush1.bf16.msra.mxu0 %v1525_v25  ;;  %1107 = vmatpush1.bf16.msra.mxu1 %v1527_v26 }
  0x7d   :  { %1065 = vmatprep.subr.bf16.mxu0 %v1542_v27  ;;  %1108 = vmatprep.subr.bf16.mxu1 %v1544_v28 }
  0x80   :  { %1066 = vmatpush1.bf16.msra.mxu0 %v1541_v33  ;;  %1109 = vmatpush1.bf16.msra.mxu1 %v1543_v34 }
  0x81   :  { %1067 = vmatprep.subr.bf16.mxu0 %v1558_v35  ;;  %1110 = vmatprep.subr.bf16.mxu1 %v1560_v36 }
  0x84   :  { %1068 = vmatpush1.bf16.msra.mxu0 %v1557_v41  ;;  %1111 = vmatpush1.bf16.msra.mxu1 %v1559_v42 }
  0x85   :  { %1069 = vmatprep.subr.bf16.mxu0 %v1574_v43  ;;  %1112 = vmatprep.subr.bf16.mxu1 %v1576_v0 }
  0x88   :  { %1070 = vmatpush1.bf16.msra.mxu0 %v1573_v48  ;;  %1113 = vmatpush1.bf16.msra.mxu1 %v1575_v49 }
  0x89   :  { %1071 = vmatprep.subr.bf16.mxu0 %v1590_v50  ;;  %1114 = vmatprep.subr.bf16.mxu1 %v1592_v51 }
  0x8c   :  { %1072 = vmatpush1.bf16.msra.mxu0 %v1589_v56  ;;  %1115 = vmatpush1.bf16.msra.mxu1 %v1591_v57 }
  0x8d   :  { %1073 = vmatprep.subr.bf16.mxu0 %v1606_v58  ;;  %1116 = vmatprep.subr.bf16.mxu1 %v1608_v59 }
  0x90   :  { %1074 = vmatpush1.bf16.msra.mxu0 %v1605_v1  ;;  %1117 = vmatpush1.bf16.msra.mxu1 %v1607_v2 }
  0x91   :  { %1075 = vmatprep.subr.bf16.mxu0 %v1622_v3  ;;  %1118 = vmatprep.subr.bf16.mxu1 %v1624_v4 }
  0x94   :  { %1076 = vmatpush1.bf16.msra.mxu0 %v1621_v5  ;;  %1119 = vmatpush1.bf16.msra.mxu1 %v1623_v6 }
  0x97   :  { %1094 = vmatmul.mubr.bf16.vlgmr.msra.gmra.mrb[12].mxu0 %v1714_v10  ;;  %1137 = vmatmul.mubr.bf16.vlgmr.msra.gmra.mrb[12].mxu1 %v1714_v10 }
 0x10a   :  { %v837_v7 = vpop.f32.mrb[0].mxu0  ;;  %v880_v8 = vpop.f32.mrb[0].mxu1 }
 0x10b   :  { %v839_v9 = vpop.f32.mrb[1].mxu0  ;;  %v882_v11 = vpop.f32.mrb[1].mxu1  ;;  %v1147_v24 = vmul.f32 %v837_v7, %v837_v7  ;;  %v1149_v26 = vmul.f32 %v880_v8, %v880_v8 }
 0x10c   :  { %v841_v12 = vpop.f32.mrb[2].mxu0  ;;  %v884_v13 = vpop.f32.mrb[2].mxu1  ;;  %v1148_v10 = vmul.f32 %v839_v9, %v839_v9  ;;  %v1150_v27 = vmul.f32 %v882_v11, %v882_v11 }
 0x10d   :  { %v843_v14 = vpop.f32.mrb[3].mxu0  ;;  %v886_v15 = vpop.f32.mrb[3].mxu1  ;;  %v1155_v31 = vmul.f32 %v841_v12, %v841_v12  ;;  %v1157_v32 = vmul.f32 %v884_v13, %v884_v13 }
 0x10e   :  { %v1156_v37 = vmul.f32 %v843_v14, %v843_v14  ;;  %v1158_v47 = vmul.f32 %v886_v15, %v886_v15 }
 0x12a   :  { %v923_v16 = vpop.f32.mrb[4].mxu0  ;;  %v966_v17 = vpop.f32.mrb[4].mxu1 }
 0x12b   :  { %v925_v18 = vpop.f32.mrb[5].mxu0  ;;  %v968_v19 = vpop.f32.mrb[5].mxu1  ;;  %v1151_v54 = vmul.f32 %v923_v16, %v923_v16  ;;  %v1153_v55 = vmul.f32 %v966_v17, %v966_v17 }
 0x12c   :  { %v927_v20 = vpop.f32.mrb[6].mxu0  ;;  %v970_v21 = vpop.f32.mrb[6].mxu1  ;;  %v1152_v56 = vmul.f32 %v925_v18, %v925_v18  ;;  %v1154_v57 = vmul.f32 %v968_v19, %v968_v19 }
 0x12d   :  { %v929_v22 = vpop.f32.mrb[7].mxu0  ;;  %v972_v23 = vpop.f32.mrb[7].mxu1  ;;  %v1159_v58 = vmul.f32 %v927_v20, %v927_v20  ;;  %v1161_v60 = vmul.f32 %v970_v21, %v970_v21 }
 0x12e   :  { %v1160_v61 = vmul.f32 %v929_v22, %v929_v22  ;;  %v1162_v62 = vmul.f32 %v972_v23, %v972_v23 }
 0x14a   :  { %v1009_v25 = vpop.f32.mrb[8].mxu0  ;;  %v1052_v29 = vpop.f32.mrb[8].mxu1 }
 0x14b   :  { %v1163_v28 = vmul.f32 %v1009_v25, %v1009_v25  ;;  %v1011_v30 = vpop.f32.mrb[9].mxu0  ;;  %v1165_v33 = vmul.f32 %v1052_v29, %v1052_v29  ;;  %v1054_v35 = vpop.f32.mrb[9].mxu1 }
 0x14c   :  { %v1164_v34 = vmul.f32 %v1011_v30, %v1011_v30  ;;  %v1013_v36 = vpop.f32.mrb[10].mxu0  ;;  %v1166_v39 = vmul.f32 %v1054_v35, %v1054_v35  ;;  %v1056_v41 = vpop.f32.mrb[10].mxu1 }
 0x14d   :  { %v1730_v38 = vadd.f32 %v1163_v28, %v1147_v24  ;;  %v1171_v40 = vmul.f32 %v1013_v36, %v1013_v36  ;;  %v1015_v42 = vpop.f32.mrb[11].mxu0  ;;  %v1732_v43 = vadd.f32 %v1165_v33, %v1149_v26  ;;  %v1173_v44 = vmul.f32 %v1056_v41, %v1056_v41  ;;  %v1058_v46 = vpop.f32.mrb[11].mxu1 }
 0x14e   :  { %v1734_v0 = vadd.f32 %v1164_v34, %v1148_v10  ;;  %v1172_v45 = vmul.f32 %v1015_v42, %v1015_v42  ;;  %v1736_v48 = vadd.f32 %v1166_v39, %v1150_v27  ;;  %v1174_v50 = vmul.f32 %v1058_v46, %v1058_v46 }
 0x14f   :  { %v1738_v49 = vadd.f32 %v1171_v40, %v1155_v31  ;;  %v1740_v51 = vadd.f32 %v1173_v44, %v1157_v32  ;;  %v1204_v7 = vmax.f32 %v1730_v38, %v1732_v43 }
 0x150   :  { %v1742_v52 = vadd.f32 %v1172_v45, %v1156_v37  ;;  %v1744_v53 = vadd.f32 %v1174_v50, %v1158_v47  ;;  %v1205_v8 = vmax.f32 %v1734_v0, %v1736_v48  ;;  %v1195_v37 = vlaneseq }
 0x151   :  { %v1213_v15 = vmax.f32 %v1738_v49, %v1740_v51 }
 0x152   :  { %v1214_v27 = vmax.f32 %v1742_v52, %v1744_v53  ;;  %v1779_v39 = vand.u32 127, %v1195_v37 }
 0x154   :  { %v1782_v40 = vadd.s32 128, %v1779_v39  ;;  %v1785_v41 = vadd.s32 256, %v1779_v39  ;;  %v1788_v42 = vadd.s32 384, %v1779_v39  ;;  %v1793_v45 = vadd.s32 512, %v1779_v39 }
 0x155   :  { %v1796_v46 = vadd.s32 640, %v1779_v39  ;;  %v1799_v47 = vadd.s32 768, %v1779_v39  ;;  %v1802_v50 = vadd.s32 896, %v1779_v39 }
 0x16a   :  { %v1095_v59 = vpop.f32.mrb[12].mxu0  ;;  %v1138_v1 = vpop.f32.mrb[12].mxu1 }
 0x16b   :  { %v1167_v63 = vmul.f32 %v1095_v59, %v1095_v59  ;;  %v1097_v2 = vpop.f32.mrb[13].mxu0  ;;  %v1169_v3 = vmul.f32 %v1138_v1, %v1138_v1  ;;  %v1140_v5 = vpop.f32.mrb[13].mxu1 }
 0x16c   :  { %v1168_v4 = vmul.f32 %v1097_v2, %v1097_v2  ;;  %v1099_v6 = vpop.f32.mrb[14].mxu0  ;;  %v1170_v11 = vmul.f32 %v1140_v5, %v1140_v5  ;;  %v1142_v13 = vpop.f32.mrb[14].mxu1 }
 0x16d   :  { %v1750_v9 = vadd.f32 %v1167_v63, %v1151_v54  ;;  %v1175_v12 = vmul.f32 %v1099_v6, %v1099_v6  ;;  %v1101_v14 = vpop.f32.mrb[15].mxu0  ;;  %v1754_v16 = vadd.f32 %v1169_v3, %v1153_v55  ;;  %v1177_v18 = vmul.f32 %v1142_v13, %v1142_v13  ;;  %v1144_v20 = vpop.f32.mrb[15].mxu1 }
 0x16e   :  { %v1756_v17 = vadd.f32 %v1168_v4, %v1152_v56  ;;  %v1176_v19 = vmul.f32 %v1101_v14, %v1101_v14  ;;  %v1758_v21 = vadd.f32 %v1170_v11, %v1154_v57  ;;  %v1178_v23 = vmul.f32 %v1144_v20, %v1144_v20 }
 0x16f   :  { %v1760_v22 = vadd.f32 %v1175_v12, %v1159_v58  ;;  %v1206_v24 = vmax.f32 %v1204_v7, %v1750_v9  ;;  %v1763_v25 = vadd.f32 %v1177_v18, %v1161_v60 }
 0x170   :  { %v1765_v26 = vadd.f32 %v1176_v19, %v1160_v61  ;;  %v1207_v10 = vmax.f32 %v1205_v8, %v1756_v17  ;;  %v1770_v28 = vadd.f32 %v1178_v23, %v1162_v62 }
 0x171   :  { %v1208_v29 = vmax.f32 %v1206_v24, %v1754_v16  ;;  %v1215_v30 = vmax.f32 %v1213_v15, %v1760_v22 }
 0x172   :  { %v1209_v31 = vmax.f32 %v1207_v10, %v1758_v21  ;;  %v1216_v32 = vmax.f32 %v1214_v27, %v1765_v26 }
 0x173   :  { %v1217_v34 = vmax.f32 %v1215_v30, %v1763_v25 }
 0x174   :  { %v1210_v33 = vmax.f32 %v1208_v29, %v1209_v31  ;;  %v1218_v35 = vmax.f32 %v1216_v32, %v1770_v28 }
 0x176   :  { %1211 = vmax.xlane.f32.xlu0 %v1210_v33  ;;  %v1219_v36 = vmax.f32 %v1217_v34, %v1218_v35 }
 0x17a   :  { %1220 = vmax.xlane.f32.xlu0 %v1219_v36 }
 0x203   :  { %v1790_v44 = vpop.xlane.xlu0 %1211 }
 0x204   :  { %vm1222_vm0 = vcmp.eq.f32.partialorder %v1730_v38, %v1790_v44  ;;  %vm1223_vm1 = vcmp.eq.f32.partialorder %v1734_v0, %v1790_v44  ;;  %vm1224_vm2 = vcmp.eq.f32.partialorder %v1732_v43, %v1790_v44  ;;  %vm1225_vm3 = vcmp.eq.f32.partialorder %v1736_v48, %v1790_v44 }
 0x205   :  { %vm1226_vm4 = vcmp.eq.f32.partialorder %v1750_v9, %v1790_v44  ;;  %vm1227_vm5 = vcmp.eq.f32.partialorder %v1756_v17, %v1790_v44  ;;  %vm1228_vm6 = vcmp.eq.f32.partialorder %v1754_v16, %v1790_v44  ;;  %vm1229_vm7 = vcmp.eq.f32.partialorder %v1758_v21, %v1790_v44 }
 0x206   :  { %v1238_v54 = vsel %vm1222_vm0, %v1779_v39, 1024  ;;  %v1239_v55 = vsel %vm1223_vm1, %v1782_v40, 1024  ;;  %v1240_v56 = vsel %vm1224_vm2, %v1785_v41, 1024  ;;  %v1241_v57 = vsel %vm1225_vm3, %v1788_v42, 1024 }
 0x207   :  { %v1824_v58 = vpop.xlane.xlu0 %1220  ;;  %v1242_v59 = vsel %vm1226_vm4, %v1793_v45, 1024  ;;  %v1243_v60 = vsel %vm1227_vm5, %v1796_v46, 1024  ;;  %v1244_v61 = vsel %vm1228_vm6, %v1799_v47, 1024  ;;  %v1245_v62 = vsel %vm1229_vm7, %v1802_v50, 1024 }
 0x208   :  { %vm1254_vm8 = vcmp.lt.s32.totalorder %v1238_v54, %v1240_v56  ;;  %vm1256_vm9 = vcmp.lt.s32.totalorder %v1239_v55, %v1241_v57  ;;  %vm1230_vm10 = vcmp.eq.f32.partialorder %v1738_v49, %v1824_v58  ;;  %vm1231_vm11 = vcmp.eq.f32.partialorder %v1742_v52, %v1824_v58 }
 0x209   :  { %v1255_v63 = vsel %vm1254_vm8, %v1238_v54, %v1240_v56  ;;  %v1257_v1 = vsel %vm1256_vm9, %v1239_v55, %v1241_v57  ;;  %vm1232_vm14 = vcmp.eq.f32.partialorder %v1740_v51, %v1824_v58  ;;  %vm1233_vm15 = vcmp.eq.f32.partialorder %v1744_v53, %v1824_v58 }
 0x20a   :  { %vm1258_vm12 = vcmp.lt.s32.totalorder %v1255_v63, %v1242_v59  ;;  %vm1260_vm13 = vcmp.lt.s32.totalorder %v1257_v1, %v1243_v60  ;;  %vm1234_vm0 = vcmp.eq.f32.partialorder %v1760_v22, %v1824_v58  ;;  %vm1235_vm1 = vcmp.eq.f32.partialorder %v1765_v26, %v1824_v58 }
 0x20b   :  { %v1259_v2 = vsel %vm1258_vm12, %v1255_v63, %v1242_v59  ;;  %v1261_v3 = vsel %vm1260_vm13, %v1257_v1, %v1243_v60  ;;  %v1246_v4 = vsel %vm1230_vm10, %v1779_v39, 1024  ;;  %v1247_v5 = vsel %vm1231_vm11, %v1782_v40, 1024 }
 0x20c   :  { %vm1262_vm2 = vcmp.lt.s32.totalorder %v1259_v2, %v1244_v61  ;;  %vm1264_vm3 = vcmp.lt.s32.totalorder %v1261_v3, %v1245_v62  ;;  %v1248_v8 = vsel %vm1232_vm14, %v1785_v41, 1024  ;;  %v1249_v11 = vsel %vm1233_vm15, %v1788_v42, 1024 }
 0x20d   :  { %v1263_v6 = vsel %vm1262_vm2, %v1259_v2, %v1244_v61  ;;  %v1265_v7 = vsel %vm1264_vm3, %v1261_v3, %v1245_v62  ;;  %vm1236_vm5 = vcmp.eq.f32.partialorder %v1763_v25, %v1824_v58  ;;  %vm1237_vm6 = vcmp.eq.f32.partialorder %v1770_v28, %v1824_v58 }
 0x20e   :  { %vm1266_vm4 = vcmp.lt.s32.totalorder %v1263_v6, %v1265_v7  ;;  %v1250_v13 = vsel %vm1234_vm0, %v1793_v45, 1024  ;;  %vm1282_vm7 = vcmp.lt.s32.totalorder %v1246_v4, %v1248_v8  ;;  %vm1284_vm8 = vcmp.lt.s32.totalorder %v1247_v5, %v1249_v11 }
 0x20f   :  { %v1267_v12 = vsel %vm1266_vm4, %v1263_v6, %v1265_v7  ;;  %v1251_v15 = vsel %vm1235_vm1, %v1796_v46, 1024  ;;  %v1283_v18 = vsel %vm1282_vm7, %v1246_v4, %v1248_v8  ;;  %v1285_v19 = vsel %vm1284_vm8, %v1247_v5, %v1249_v11 }
 0x210   :  { %v1269_v14 = vshra.s32 %v1267_v12, 16  ;;  %v1252_v20 = vsel %vm1236_vm5, %v1799_v47, 1024  ;;  %vm1286_vm9 = vcmp.lt.s32.totalorder %v1283_v18, %v1250_v13  ;;  %vm1288_vm10 = vcmp.lt.s32.totalorder %v1285_v19, %v1251_v15 }
 0x211   :  { %v1253_v24 = vsel %vm1237_vm6, %v1802_v50, 1024  ;;  %v1287_v10 = vsel %vm1286_vm9, %v1283_v18, %v1250_v13  ;;  %v1289_v27 = vsel %vm1288_vm10, %v1285_v19, %v1251_v15  ;;  %v1268_v34 = vand.u32 65535, %v1267_v12 }
 0x212   :  { %v1271_v23 = vcvt.s32.f32 %v1269_v14  ;;  %vm1290_vm11 = vcmp.lt.s32.totalorder %v1287_v10, %v1252_v20  ;;  %vm1292_vm12 = vcmp.lt.s32.totalorder %v1289_v27, %v1253_v24 }
 0x213   :  { %v1291_v29 = vsel %vm1290_vm11, %v1287_v10, %v1252_v20  ;;  %v1293_v30 = vsel %vm1292_vm12, %v1289_v27, %v1253_v24  ;;  %v1270_v36 = vcvt.s32.f32 %v1268_v34 }
 0x214   :  { %1272 = vmin.xlane.f32.xlu1 %v1271_v23  ;;  %vm1294_vm13 = vcmp.lt.s32.totalorder %v1291_v29, %v1293_v30 }
 0x215   :  { %v1295_v31 = vsel %vm1294_vm13, %v1291_v29, %v1293_v30 }
 0x216   :  { %v1297_v32 = vshra.s32 %v1295_v31, 16  ;;  %v1296_v55 = vand.u32 65535, %v1295_v31 }
 0x218   :  { %v1299_v33 = vcvt.s32.f32 %v1297_v32  ;;  %v1298_v57 = vcvt.s32.f32 %v1296_v55 }
 0x21a   :  { %1300 = vmin.xlane.f32.xlu1 %v1299_v33 }
 0x2a1   :  { %v1273_v35 = vpop.xlane.xlu1 %1272 }
 0x2a2   :  { %vm1274_vm14 = vcmp.eq.f32.partialorder %v1271_v23, %v1273_v35  ;;  %v1279_v60 = vcvt.f32.s32 %v1273_v35 }
 0x2a3   :  { %v1275_v54 = vsel %vm1274_vm14, %v1270_v36, inf }
 0x2a4   :  { %1276 = vmin.xlane.f32.xlu0 %v1275_v54  ;;  %v1280_v62 = vshll.u32 %v1279_v60, 16 }
 0x2a7   :  { %v1301_v56 = vpop.xlane.xlu1 %1300 }
 0x2a8   :  { %vm1302_vm15 = vcmp.eq.f32.partialorder %v1299_v33, %v1301_v56  ;;  %v1307_v2 = vcvt.f32.s32 %v1301_v56 }
 0x2a9   :  { %v1303_v59 = vsel %vm1302_vm15, %v1298_v57, inf }
 0x2aa   :  { %1304 = vmin.xlane.f32.xlu1 %v1303_v59  ;;  %v1308_v5 = vshll.u32 %v1307_v2, 16 }
 0x331   :  { %v1277_v61 = vpop.xlane.xlu0 %1276 }
 0x332   :  { %v1278_v63 = vcvt.f32.s32 %v1277_v61 }
 0x334   :  { %v1857_v1 = vadd.s32 %v1280_v62, %v1278_v63 }
 0x336   :  { %v1625_v3 = vadd.s32 4294967295, %v1857_v1  ;;  %v1868_v12 = vadd.s32 1, %v1857_v1 }
 0x337   :  { %v1305_v4 = vpop.xlane.xlu1 %1304 }
 0x338   :  { %vm1312_vm0 = vcmp.eq.s32.totalorder %v1779_v39, %v1625_v3  ;;  %vm1313_vm1 = vcmp.eq.s32.totalorder %v1782_v40, %v1625_v3  ;;  %v1306_v6 = vcvt.f32.s32 %v1305_v4  ;;  %vm1314_vm2 = vcmp.eq.s32.totalorder %v1785_v41, %v1625_v3 }
 0x339   :  { %v1328_v7 = vsel %vm1312_vm0, %v1730_v38, 0.0  ;;  %v1329_v8 = vsel %vm1313_vm1, %v1734_v0, 0.0  ;;  %vm1315_vm3 = vcmp.eq.s32.totalorder %v1788_v42, %v1625_v3  ;;  %vm1316_vm4 = vcmp.eq.s32.totalorder %v1793_v45, %v1625_v3 }
 0x33a   :  { %v1865_v11 = vadd.s32 %v1308_v5, %v1306_v6  ;;  %v1344_v13 = vadd.f32 %v1329_v8, %v1328_v7  ;;  %v1330_v15 = vsel %vm1314_vm2, %v1732_v43, 0.0  ;;  %vm1317_vm5 = vcmp.eq.s32.totalorder %v1796_v46, %v1625_v3 }
 0x33b   :  { %v1331_v19 = vsel %vm1315_vm3, %v1736_v48, 0.0  ;;  %vm1318_vm8 = vcmp.eq.s32.totalorder %v1799_v47, %v1625_v3  ;;  %v1332_v20 = vsel %vm1316_vm4, %v1750_v9, 0.0  ;;  %vm1364_vm9 = vcmp.eq.s32.totalorder %v1779_v39, %v1868_v12 }
 0x33c   :  { %v1872_v14 = vadd.s32 4294967295, %v1865_v11  ;;  %v1345_v18 = vadd.f32 %v1344_v13, %v1330_v15  ;;  %vm1365_vm11 = vcmp.eq.s32.totalorder %v1782_v40, %v1868_v12  ;;  %vm1319_vm12 = vcmp.eq.s32.totalorder %v1802_v50, %v1625_v3 }
 0x33d   :  { %v1333_v27 = vsel %vm1317_vm5, %v1756_v17, 0.0  ;;  %v1895_v30 = vadd.s32 1, %v1865_v11  ;;  %v1334_v31 = vsel %vm1318_vm8, %v1754_v16, 0.0  ;;  %v1380_v35 = vsel %vm1364_vm9, %v1730_v38, 0.0 }
 0x33e   :  { %vm1320_vm6 = vcmp.eq.s32.totalorder %v1779_v39, %v1872_v14  ;;  %vm1321_vm7 = vcmp.eq.s32.totalorder %v1782_v40, %v1872_v14  ;;  %v1346_v23 = vadd.f32 %v1345_v18, %v1331_v19  ;;  %vm1322_vm10 = vcmp.eq.s32.totalorder %v1785_v41, %v1872_v14 }
 0x33f   :  { %v1336_v24 = vsel %vm1320_vm6, %v1738_v49, 0.0  ;;  %v1337_v10 = vsel %vm1321_vm7, %v1742_v52, 0.0  ;;  %vm1323_vm13 = vcmp.eq.s32.totalorder %v1788_v42, %v1872_v14  ;;  %v1338_v34 = vsel %vm1322_vm10, %v1740_v51, 0.0 }
 0x340   :  { %v1347_v29 = vadd.f32 %v1346_v23, %v1332_v20  ;;  %v1353_v32 = vadd.f32 %v1337_v10, %v1336_v24  ;;  %v1381_v36 = vsel %vm1365_vm11, %v1734_v0, 0.0  ;;  %v1335_v54 = vsel %vm1319_vm12, %v1758_v21, 0.0 }
 0x341   :  { %vm1324_vm14 = vcmp.eq.s32.totalorder %v1793_v45, %v1872_v14  ;;  %vm1366_vm15 = vcmp.eq.s32.totalorder %v1785_v41, %v1868_v12  ;;  %vm1325_vm0 = vcmp.eq.s32.totalorder %v1796_v46, %v1872_v14  ;;  %v1339_v57 = vsel %vm1323_vm13, %v1744_v53, 0.0 }
 0x342   :  { %v1348_v33 = vadd.f32 %v1347_v29, %v1333_v27  ;;  %v1354_v55 = vadd.f32 %v1353_v32, %v1338_v34  ;;  %vm1367_vm1 = vcmp.eq.s32.totalorder %v1788_v42, %v1868_v12  ;;  %v1396_v0 = vadd.f32 %v1381_v36, %v1380_v35 }
 0x343   :  { %vm1372_vm2 = vcmp.eq.s32.totalorder %v1779_v39, %v1895_v30  ;;  %vm1373_vm3 = vcmp.eq.s32.totalorder %v1782_v40, %v1895_v30  ;;  %v1340_v60 = vsel %vm1324_vm14, %v1760_v22, 0.0  ;;  %vm1368_vm4 = vcmp.eq.s32.totalorder %v1793_v45, %v1868_v12 }
 0x344   :  { %v1349_v56 = vadd.f32 %v1348_v33, %v1334_v31  ;;  %v1355_v38 = vadd.f32 %v1354_v55, %v1339_v57  ;;  %v1382_v61 = vsel %vm1366_vm15, %v1732_v43, 0.0  ;;  %vm1326_vm5 = vcmp.eq.s32.totalorder %v1799_v47, %v1872_v14 }
 0x345   :  { %v1341_v62 = vsel %vm1325_vm0, %v1765_v26, 0.0  ;;  %v1397_v2 = vadd.f32 %v1396_v0, %v1382_v61  ;;  %v1383_v39 = vsel %vm1367_vm1, %v1736_v48, 0.0  ;;  %vm1374_vm6 = vcmp.eq.s32.totalorder %v1785_v41, %v1895_v30 }
 0x346   :  { %v1350_v59 = vadd.f32 %v1349_v56, %v1335_v54  ;;  %v1356_v63 = vadd.f32 %v1355_v38, %v1340_v60  ;;  %v1388_v40 = vsel %vm1372_vm2, %v1738_v49, 0.0  ;;  %v1389_v3 = vsel %vm1373_vm3, %v1742_v52, 0.0 }
 0x347   :  { %vm1327_vm7 = vcmp.eq.s32.totalorder %v1802_v50, %v1872_v14  ;;  %vm1369_vm8 = vcmp.eq.s32.totalorder %v1796_v46, %v1868_v12  ;;  %v1398_v4 = vadd.f32 %v1397_v2, %v1383_v39  ;;  %v1342_v5 = vsel %vm1326_vm5, %v1763_v25, 0.0 }
 0x348   :  { %1351 = vadd.xlane.f32.xlu0 %v1350_v59  ;;  %v1357_v43 = vadd.f32 %v1356_v63, %v1341_v62  ;;  %v1384_v48 = vsel %vm1368_vm4, %v1750_v9, 0.0  ;;  %vm1375_vm9 = vcmp.eq.s32.totalorder %v1788_v42, %v1895_v30  ;;  %v1405_v49 = vadd.f32 %v1389_v3, %v1388_v40 }
 0x349   :  { %vm1370_vm10 = vcmp.eq.s32.totalorder %v1799_v47, %v1868_v12  ;;  %v1399_v41 = vadd.f32 %v1398_v4, %v1384_v48  ;;  %v1390_v6 = vsel %vm1374_vm6, %v1740_v51, 0.0  ;;  %v1343_v7 = vsel %vm1327_vm7, %v1770_v28, 0.0 }
 0x34a   :  { %v1358_v52 = vadd.f32 %v1357_v43, %v1342_v5  ;;  %v1385_v8 = vsel %vm1369_vm8, %v1756_v17, 0.0  ;;  %vm1376_vm11 = vcmp.eq.s32.totalorder %v1793_v45, %v1895_v30  ;;  %v1406_v13 = vadd.f32 %v1405_v49, %v1390_v6 }
 0x34b   :  { %vm1371_vm12 = vcmp.eq.s32.totalorder %v1802_v50, %v1868_v12  ;;  %v1400_v42 = vadd.f32 %v1399_v41, %v1385_v8  ;;  %v1391_v14 = vsel %vm1375_vm9, %v1744_v53, 0.0  ;;  %v1386_v15 = vsel %vm1370_vm10, %v1754_v16, 0.0 }
 0x34c   :  { %v1359_v9 = vadd.f32 %v1358_v52, %v1343_v7  ;;  %vm1377_vm13 = vcmp.eq.s32.totalorder %v1796_v46, %v1895_v30  ;;  %v1407_v51 = vadd.f32 %v1406_v13, %v1391_v14  ;;  %v1392_v17 = vsel %vm1376_vm11, %v1760_v22, 0.0 }
 0x34d   :  { %v1401_v18 = vadd.f32 %v1400_v42, %v1386_v15  ;;  %v1387_v45 = vsel %vm1371_vm12, %v1758_v21, 0.0  ;;  %vm1378_vm14 = vcmp.eq.s32.totalorder %v1799_v47, %v1895_v30  ;;  %v1393_v20 = vsel %vm1377_vm13, %v1765_v26, 0.0 }
 0x34e   :  { %1360 = vadd.xlane.f32.xlu1 %v1359_v9  ;;  %v1408_v19 = vadd.f32 %v1407_v51, %v1392_v17  ;;  %vm1379_vm15 = vcmp.eq.s32.totalorder %v1802_v50, %v1895_v30  ;;  %v1394_v16 = vsel %vm1378_vm14, %v1763_v25, 0.0  ;;  %v1415_v56 = vcvt.s32.f32 %v1865_v11 }
 0x34f   :  { %v1402_v12 = vadd.f32 %v1401_v18, %v1387_v45  ;;  %v1395_v23 = vsel %vm1379_vm15, %v1770_v28, 0.0  ;;  %vm1448_vm3 = vcmp.gt.s32.totalorder %v1857_v1, 0  ;;  %vm1450_vm4 = vcmp.lt.s32.totalorder %v1857_v1, 1004 }
 0x350   :  { %v1409_v53 = vadd.f32 %v1408_v19, %v1393_v20  ;;  %v1417_v60 = vmul.f32 0.13923268, %v1415_v56  ;;  %vm1449_vm6 = vcmp.gt.s32.totalorder %v1865_v11, 0  ;;  %vm1451_vm7 = vcmp.lt.s32.totalorder %v1865_v11, 1004  ;;  %vm1452_vm10 = vmand %vm1448_vm3, %vm1450_vm4 }
 0x351   :  { %1403 = vadd.xlane.f32.xlu0 %v1402_v12  ;;  %vm1456_vm8 = vcmp.eq.s32.totalorder %v1857_v1, 0  ;;  %vm1457_vm9 = vcmp.eq.s32.totalorder %v1865_v11, 0  ;;  %v1463_v5 = vshrl.u32 %v1195_v37, 7  ;;  %vm1453_vm11 = vmand %vm1449_vm6, %vm1451_vm7  ;;  %v1680_v48 = vmov 179.88861  }
 0x352   :  { %v1410_v46 = vadd.f32 %v1409_v53, %v1394_v16  ;;  %v1419_v40 = vadd.f32 40.09901, %v1417_v60  ;;  %v1458_v49 = vsel %vm1456_vm8, 40.09901, %v1680_v48  ;;  %v1459_v52 = vsel %vm1457_vm9, 40.09901, %v1680_v48 }
 0x353   :  { %vm1466_vm12 = vcmp.lt.s32.totalorder %v1463_v5, 2  ;;  %vm1468_vm13 = vcmask 7168  }
 0x354   :  { %v1411_v22 = vadd.f32 %v1410_v46, %v1395_v23 }
 0x356   :  { %1412 = vadd.xlane.f32.xlu1 %v1411_v22 }
 0x3d5   :  { %v1352_v21 = vpop.xlane.xlu0 %1351 }
 0x3d6   :  { %v1420_v47 = vsub.f32 %v1790_v44, %v1352_v21 }
 0x3db   :  { %v1361_v24 = vpop.xlane.xlu1 %1360 }
 0x3dc   :  { %v1421_v50 = vsub.f32 %v1824_v58, %v1361_v24 }
 0x3de   :  { %v1404_v10 = vpop.xlane.xlu0 %1403 }
 0x3df   :  { %v1422_v27 = vsub.f32 %v1790_v44, %v1404_v10  ;;  %v1414_v44 = vcvt.s32.f32 %v1857_v1 }
 0x3e1   :  { %v1426_v26 = vmax.f32 %v1420_v47, %v1422_v27  ;;  %v1424_v32 = vmin.f32 %v1420_v47, %v1422_v27  ;;  %vm1440_vm2 = vcmp.gt.f32.partialorder %v1422_v27, %v1420_v47 }
 0x3e3   :  { %vm1428_vm0 = vcmp.gt.f32.partialorder %v1426_v26, 0.0  ;;  %v1413_v29 = vpop.xlane.xlu1 %1412 }
 0x3e4   :  { %v1430_v30 = vsel %vm1428_vm0, %v1426_v26, 1.0  ;;  %v1423_v25 = vsub.f32 %v1824_v58, %v1413_v29  ;;  %v1416_v58 = vmul.f32 0.13923268, %v1414_v44 }
 0x3e5   :  { %1636 = vrcp.f32 %v1430_v30 }
 0x3e6   :  { %v1427_v28 = vmax.f32 %v1421_v50, %v1423_v25  ;;  %v1425_v36 = vmin.f32 %v1421_v50, %v1423_v25  ;;  %v1418_v63 = vadd.f32 40.09901, %v1416_v58  ;;  %vm1441_vm5 = vcmp.gt.f32.partialorder %v1423_v25, %v1421_v50 }
 0x3e8   :  { %vm1429_vm1 = vcmp.gt.f32.partialorder %v1427_v28, 0.0 }
 0x3e9   :  { %v1431_v31 = vsel %vm1429_vm1, %v1427_v28, 1.0 }
 0x3ea   :  { %1638 = vrcp.f32 %v1431_v31 }
 0x3ef   :  { %v1637_v33 = vpop.eup %1636 }
 0x3f0   :  { %v1433_v34 = vmul.f32 %v1637_v33, %v1424_v32 }
 0x3f2   :  { %v1436_v35 = vsub.f32 1.0, %v1433_v34 }
 0x3f4   :  { %v1639_v54 = vpop.eup %1638  ;;  %v1438_v55 = vmul.f32 0.13923268, %v1436_v35 }
 0x3f5   :  { %v1435_v57 = vmul.f32 %v1639_v54, %v1425_v36 }
 0x3f6   :  { %v1442_v38 = vsub.f32 0.0, %v1438_v55 }
 0x3f7   :  { %v1437_v0 = vsub.f32 1.0, %v1435_v57 }
 0x3f8   :  { %v1444_v59 = vsel %vm1440_vm2, %v1442_v38, %v1438_v55 }
 0x3f9   :  { %v1439_v61 = vmul.f32 0.13923268, %v1437_v0  ;;  %v1446_v62 = vsel %vm1428_vm0, %v1444_v59, 0.0 }
 0x3fa   :  { %v1454_v39 = vadd.f32 %v1446_v62, %v1418_v63 }
 0x3fb   :  { %v1443_v2 = vsub.f32 0.0, %v1439_v61 }
 0x3fc   :  { %v1460_v41 = vsel %vm1452_vm10, %v1454_v39, %v1458_v49 }
 0x3fd   :  { %v1445_v3 = vsel %vm1441_vm5, %v1443_v2, %v1439_v61 }
 0x3fe   :  { %v1447_v43 = vsel %vm1429_vm1, %v1445_v3, 0.0 }
 0x3ff   :  { %v1455_v4 = vadd.f32 %v1447_v43, %v1419_v40 }
 0x401   :  { %v1461_v6 = vsel %vm1453_vm11, %v1455_v4, %v1459_v52 }
 0x402   :  { %v1464_v7 = vsub.f32 %v1460_v41, %v1461_v6 }
 0x404   :  { %v1465_v1 = vand.u32 2147483647, %v1464_v7 }
 0x406   :  { %v1467_v8 = vsel %vm1466_vm12, %v1465_v1, 0.0 }
 0x407   :  { %v1469_v13 = vsel %vm1468_vm13, %v1467_v8, 0.0 }
 0x408   :  { %1470 = vadd.xlane.f32.xlu0 %v1469_v13 }
 0x495   :  { %v1471_v11 = vpop.xlane.xlu0 %1470 }
 0x496   :  { %v1472_v9 = vrot.slane %v1471_v11, 4 }
 0x498   :  { %v1473_v42 = vadd.f32 %v1472_v9, %v1471_v11 }
 0x49a   :  { %v1474_v14 = vrot.slane %v1473_v42, 2 }
 0x49c   :  { %v1475_v15 = vadd.f32 %v1474_v14, %v1473_v42 }
 0x49e   :  { %v1476_v51 = vrot.slane %v1475_v15, 1 }
 0x4a0   :  { %v1477_v37 = vadd.f32 %v1476_v51, %v1475_v15 }
 0x4a2   :  { %1627 = vpush %v1477_v37 }
 0x4d3   :  { %s1628_s0 = spop %1627 }
 0x4d4   :  { %s1479_s24 = smul.f32 0.5, %s1628_s0 }
 0x4d6   :  { %1481 = sst [smem:[#allocation5]] %s1479_s24 }
 0x4d7   :  { %1671 = shalt.err (!%p1668_p10)
}
 0x4d8   :  { %s1681_s4 = smov [#allocation5]  }
 0x4d9   :  { %1489 = dma.smem_to_hbm %s1681_s4, 16, %s1993_s2, [#allocation4]  }
 0x4da   :  { %1674 = dma.done.wait [#allocation4], 16  }
 0x4db   :  { %1675 = vsyncadd [#allocation4], 4294967280 }
 0x4dc   :  { %1493 = sfence }
 0x4dd   :  { %1494 = vsyncpa [#allocation3], 1 }
 0x4de   :  { %1495 = vsyncpa [#allocation4], 1 }

</bundles_post_ra>
